<compile_context>
chip_gen: v7x
topology: tpu7x:2x2x1
jax: 0.10.0
libtpu: 0.0.40
codegen_flags: <defaults>
</compile_context>

<pallas_src>
import functools

import jax
import jax.numpy as jnp
from jax.experimental import pallas as pl
from jax.experimental.pallas import tpu as pltpu

LANE = 128
SUBLANE = 8
HID1, HID2, HID3 = 128, 64, 32


def _round_up(n, m):
    return ((n + m - 1) // m) * m


# ----------------------------------------------------------------------------
# Kernel
# ----------------------------------------------------------------------------
def dnn_kernel(x_ref, w1_ref, b1_ref, w2_ref, b2_ref, w3_ref, b3_ref,
               wo_ref, bo_ref, probs_ref, hid_ref):
    """One batch tile: fused fc1+bn1+relu -> fc2+bn2+relu -> fc3+bn3+relu
    -> output_layer -> softmax. All weights are BN-folded and lane-padded."""
    cdt = w1_ref.dtype  # compute dtype for MXU operands (f32 or bf16)

    # fc1 (+folded bn1) + relu; dropout = identity at inference
    h1 = jnp.dot(x_ref[...], w1_ref[...],
                 preferred_element_type=jnp.float32) + b1_ref[...]
    h1 = jnp.maximum(h1, 0.0)

    # fc2 (+folded bn2) + relu
    h2 = jnp.dot(h1.astype(cdt), w2_ref[...],
                 preferred_element_type=jnp.float32) + b2_ref[...]
    h2 = jnp.maximum(h2, 0.0)

    # fc3 (+folded bn3) + relu  -> (TB, 128); columns >= 32 are exactly zero
    h3 = jnp.dot(h2.astype(cdt), w3_ref[...],
                 preferred_element_type=jnp.float32) + b3_ref[...]
    h3 = jnp.maximum(h3, 0.0)

    # output_layer + softmax over last dim. Padded logit columns carry a
    # -1e30 bias so exp() there is exactly 0 and the sum is unaffected.
    logits = jnp.dot(h3.astype(cdt), wo_ref[...],
                     preferred_element_type=jnp.float32) + bo_ref[...]
    m = jnp.max(logits, axis=-1, keepdims=True)
    e = jnp.exp(logits - m)
    denom = jnp.sum(e, axis=-1, keepdims=True)
    probs_ref[...] = e * pl.reciprocal(denom, approx=True)
    hid_ref[...] = h3


# ----------------------------------------------------------------------------
# One-time parameter preparation (hoisted out of the per-call path)
# ----------------------------------------------------------------------------
def fold_bn(w, b, gamma, beta, mean, var, eps=1e-5):
    """Fold eval-mode BatchNorm1d into the preceding Linear.
    w: (in, out); b/gamma/beta/mean/var: (out,)."""
    scale = gamma / jnp.sqrt(var + eps)
    return w * scale[None, :], scale * (b - mean) + beta


def prepare_params(params, compute_dtype=jnp.float32):
    """Fold BN, zero/neg-pad to lane-dense shapes, cast matmul operands.
    Call this ONCE (outside the hot path); biases stay f32."""
    w1, b1 = fold_bn(params["w1"], params["b1"], params["g1"], params["be1"],
                     params["m1"], params["v1"])
    w2, b2 = fold_bn(params["w2"], params["b2"], params["g2"], params["be2"],
                     params["m2"], params["v2"])
    w3, b3 = fold_bn(params["w3"], params["b3"], params["g3"], params["be3"],
                     params["m3"], params["v3"])
    wo, bo = params["wo"], params["bo"]

    in_size = w1.shape[0]
    out_size = wo.shape[1]
    in_pad = _round_up(in_size, LANE)
    out_pad = _round_up(out_size, LANE)

    # Pad input features (extra rows of w1 are zero -> x pad columns ignored).
    w1p = jnp.zeros((in_pad, HID1), jnp.float32).at[:in_size, :].set(w1)
    # Pad hidden3 32 -> 128 (extra columns zero -> h3 pad columns are 0).
    w3p = jnp.zeros((HID2, LANE), jnp.float32).at[:, :HID3].set(w3)
    b3p = jnp.zeros((LANE,), jnp.float32).at[:HID3].set(b3)
    # Pad output 10 -> 128; padded columns get -1e30 bias (softmax-neutral).
    wop = jnp.zeros((LANE, out_pad), jnp.float32).at[:HID3, :out_size].set(wo)
    bop = jnp.full((out_pad,), -1e30, jnp.float32).at[:out_size].set(bo)

    weights = (
        w1p.astype(compute_dtype), b1.reshape(1, -1),
        w2.astype(compute_dtype), b2.reshape(1, -1),
        w3p.astype(compute_dtype), b3p.reshape(1, -1),
        wop.astype(compute_dtype), bop.reshape(1, -1),
    )
    meta = dict(in_size=in_size, in_pad=in_pad,
                out_size=out_size, out_pad=out_pad,
                compute_dtype=compute_dtype)
    return dict(weights=weights, meta=meta)


# ----------------------------------------------------------------------------
# Forward wrapper (jitted end-to-end; weights are captured, not re-folded)
# ----------------------------------------------------------------------------
def make_forward_fn(prep, *, batch_tile=256):
    weights = prep["weights"]
    meta = prep["meta"]
    in_size, in_pad = meta["in_size"], meta["in_pad"]
    out_size, out_pad = meta["out_size"], meta["out_pad"]
    cdt = meta["compute_dtype"]

    def forward(x):
        B = x.shape[0]
        # Batch tile: multiple of 8 sublanes, capped (v7x-safe VMEM budget:
        # TB=256 f32 x/outputs + resident weights is well under 1 MiB).
        tb = min(batch_tile, _round_up(B, SUBLANE))
        b_pad = _round_up(B, tb)

        # Zero-pad batch and features to lane/sublane-dense shapes.
        x_p = jnp.zeros((b_pad, in_pad), cdt).at[:B, :in_size].set(
            x.astype(cdt))

        grid = (b_pad // tb,)
        tile_spec = lambda cols: pl.BlockSpec((tb, cols), lambda i: (i, 0))
        const_spec = lambda shape: pl.BlockSpec(shape, lambda i: (0, 0))

        probs_p, hid_p = pl.pallas_call(
            dnn_kernel,
            out_shape=(
                jax.ShapeDtypeStruct((b_pad, out_pad), jnp.float32),
                jax.ShapeDtypeStruct((b_pad, LANE), jnp.float32),
            ),
            grid=grid,
            in_specs=[
                tile_spec(in_pad),                # x tile
                const_spec((in_pad, HID1)),       # w1 (VMEM-resident)
                const_spec((1, HID1)),            # b1
                const_spec((HID1, HID2)),         # w2
                const_spec((1, HID2)),            # b2
                const_spec((HID2, LANE)),         # w3 (padded to 128 cols)
                const_spec((1, LANE)),            # b3
                const_spec((LANE, out_pad)),      # wo (padded)
                const_spec((1, out_pad)),         # bo (padded with -1e30)
            ],
            out_specs=(tile_spec(out_pad), tile_spec(LANE)),
            compiler_params=pltpu.CompilerParams(
                dimension_semantics=("parallel",)),
        )(x_p, *weights)

        # Slice back to the module's true output shapes.
        return probs_p[:B, :out_size], hid_p[:B, :HID3]

    return jax.jit(forward)


# ----------------------------------------------------------------------------
# Synthetic parameters + pure-JAX reference
# ----------------------------------------------------------------------------
def make_params(key, input_size, output_size):
    """Deterministic synthetic parameters (no checkpoint loading)."""
    ks = jax.random.split(key, 16)

    def lin(kw, kb, fan_in, fan_out):
        bound = 1.0 / jnp.sqrt(fan_in)
        w = jax.random.uniform(kw, (fan_in, fan_out), jnp.float32, -bound, bound)
        b = jax.random.uniform(kb, (fan_out,), jnp.float32, -bound, bound)
        return w, b

    def bn(kg, kb, km, kv, n):
        gamma = 1.0 + 0.1 * jax.random.normal(kg, (n,), jnp.float32)
        beta = 0.1 * jax.random.normal(kb, (n,), jnp.float32)
        mean = 0.1 * jax.random.normal(km, (n,), jnp.float32)
        var = 1.0 + 0.1 * jax.random.uniform(kv, (n,), jnp.float32)
        return gamma, beta, mean, var

    w1, b1 = lin(ks[0], ks[1], input_size, 128)
    g1, be1, m1, v1 = bn(ks[2], ks[3], ks[4], ks[5], 128)
    w2, b2 = lin(ks[6], ks[7], 128, 64)
    g2, be2, m2, v2 = bn(ks[8], ks[9], ks[10], ks[11], 64)
    w3, b3 = lin(ks[12], ks[13], 64, 32)
    g3, be3, m3, v3 = bn(ks[14], ks[15], jax.random.fold_in(key, 100),
                         jax.random.fold_in(key, 101), 32)
    wo, bo = lin(jax.random.fold_in(key, 200), jax.random.fold_in(key, 201),
                 32, output_size)
    # TODO(synk): concat=True branch (fc4/bn4 + output_layer1 + Sigmoid) is not
    # wired into the kernel; only the default concat=False path is implemented.
    return dict(w1=w1, b1=b1, g1=g1, be1=be1, m1=m1, v1=v1,
                w2=w2, b2=b2, g2=g2, be2=be2, m2=m2, v2=v2,
                w3=w3, b3=b3, g3=g3, be3=be3, m3=m3, v3=v3,
                wo=wo, bo=bo)


def reference_forward(x, params):
    """Pure-JAX reference of the same forward pass (unfolded BN)."""
    def bn_relu(h, g, be, m, v, eps=1e-5):
        return jnp.maximum((h - m) / jnp.sqrt(v + eps) * g + be, 0.0)

    h = x @ params["w1"] + params["b1"]
    h = bn_relu(h, params["g1"], params["be1"], params["m1"], params["v1"])
    h = h @ params["w2"] + params["b2"]
    h = bn_relu(h, params["g2"], params["be2"], params["m2"], params["v2"])
    h = h @ params["w3"] + params["b3"]
    h3 = bn_relu(h, params["g3"], params["be3"], params["m3"], params["v3"])
    logits = h3 @ params["wo"] + params["bo"]
    probs = jax.nn.softmax(logits, axis=-1)
    return probs, h3


if __name__ == "__main__":
    key = jax.random.PRNGKey(0)
    batch = 8
    input_size = 32
    output_size = 10

    kx, kp = jax.random.split(key)
    x = jax.random.normal(kx, (batch, input_size), jnp.float32)
    params = make_params(kp, input_size, output_size)

    # One-time prep (BN fold, padding, dtype) — hoisted out of the hot path.
    prep = prepare_params(params, compute_dtype=jnp.float32)
    forward = make_forward_fn(prep, batch_tile=256)

    probs, hidden = forward(x)
    jax.block_until_ready((probs, hidden))

    ref_probs, ref_hidden = reference_forward(x, params)
    assert probs.shape == (batch, output_size)
    assert hidden.shape == (batch, 32)
    # Hidden layer checked tightly (exercises all matmul/BN-fold/relu math).
    assert jnp.allclose(hidden, ref_hidden, atol=1e-5, rtol=1e-5)
    # Probs tolerance loosened slightly: softmax denom uses the EUP
    # approximate reciprocal (pl.reciprocal(..., approx=True)).
    assert jnp.allclose(probs, ref_probs, atol=1e-3, rtol=2e-2)
    assert jnp.allclose(jnp.sum(probs, axis=-1), 1.0, atol=2e-3)

    # Optional bf16 compute path (v6e/v7x MXU throughput); f32 accumulation.
    prep_bf16 = prepare_params(params, compute_dtype=jnp.bfloat16)
    forward_bf16 = make_forward_fn(prep_bf16, batch_tile=256)
    probs_b, hidden_b = forward_bf16(x)
    jax.block_until_ready((probs_b, hidden_b))
    assert probs_b.shape == (batch, output_size)
    assert hidden_b.shape == (batch, 32)
    assert bool(jnp.all(jnp.isfinite(probs_b)))
    assert jnp.allclose(jnp.sum(probs_b, axis=-1), 1.0, atol=1e-2)

    print("KERNEL_OK")
</pallas_src>

<mosaic_0001>
module attributes {stable_mosaic.version = 11 : i64} {
  func.func @dnn_kernel(%arg0: i32, %arg1: memref<8x128xf32, #tpu.memory_space<vmem>>, %arg2: memref<128x128xf32, #tpu.memory_space<vmem>>, %arg3: memref<1x128xf32, #tpu.memory_space<vmem>>, %arg4: memref<128x64xf32, #tpu.memory_space<vmem>>, %arg5: memref<1x64xf32, #tpu.memory_space<vmem>>, %arg6: memref<64x128xf32, #tpu.memory_space<vmem>>, %arg7: memref<1x128xf32, #tpu.memory_space<vmem>>, %arg8: memref<128x128xf32, #tpu.memory_space<vmem>>, %arg9: memref<1x128xf32, #tpu.memory_space<vmem>>, %arg10: memref<8x128xf32, #tpu.memory_space<vmem>>, %arg11: memref<8x128xf32, #tpu.memory_space<vmem>>) attributes {dimension_semantics = [#tpu.dimension_semantics<parallel>], iteration_bounds = array<i64: 1>, scalar_prefetch = 0 : i64, scratch_operands = 0 : i64, tpu.core_type = #tpu.core_type<tc>, window_params = [{transform_indices = @transform_0, window_bounds = array<i64: 8, 128>}, {pipeline_mode = #tpu.pipeline_mode<synchronous>, transform_indices = @transform_1, window_bounds = array<i64: 128, 128>}, {pipeline_mode = #tpu.pipeline_mode<synchronous>, transform_indices = @transform_2, window_bounds = array<i64: 1, 128>}, {pipeline_mode = #tpu.pipeline_mode<synchronous>, transform_indices = @transform_3, window_bounds = array<i64: 128, 64>}, {pipeline_mode = #tpu.pipeline_mode<synchronous>, transform_indices = @transform_4, window_bounds = array<i64: 1, 64>}, {pipeline_mode = #tpu.pipeline_mode<synchronous>, transform_indices = @transform_5, window_bounds = array<i64: 64, 128>}, {pipeline_mode = #tpu.pipeline_mode<synchronous>, transform_indices = @transform_6, window_bounds = array<i64: 1, 128>}, {pipeline_mode = #tpu.pipeline_mode<synchronous>, transform_indices = @transform_7, window_bounds = array<i64: 128, 128>}, {pipeline_mode = #tpu.pipeline_mode<synchronous>, transform_indices = @transform_8, window_bounds = array<i64: 1, 128>}, {transform_indices = @transform_9, window_bounds = array<i64: 8, 128>}, {transform_indices = @transform_10, window_bounds = array<i64: 8, 128>}]} {
    %c0 = arith.constant 0 : index
    %c0_0 = arith.constant 0 : index
    %0 = vector.load %arg1[%c0, %c0_0] : memref<8x128xf32, #tpu.memory_space<vmem>>, vector<8x128xf32>
    %c0_1 = arith.constant 0 : index
    %c0_2 = arith.constant 0 : index
    %1 = vector.load %arg2[%c0_1, %c0_2] : memref<128x128xf32, #tpu.memory_space<vmem>>, vector<128x128xf32>
    %cst = arith.constant dense<0.000000e+00> : vector<8x128xf32>
    %2 = tpu.matmul %0, %1, %cst {dimension_numbers = #tpu.dot_dimension_numbers<[1], [0], [0], [1], [0, 0, 1, 1], [], []>} : vector<8x128xf32>, vector<128x128xf32>, vector<8x128xf32> -> vector<8x128xf32>
    %c0_3 = arith.constant 0 : index
    %c0_4 = arith.constant 0 : index
    %3 = vector.load %arg3[%c0_3, %c0_4] : memref<1x128xf32, #tpu.memory_space<vmem>>, vector<1x128xf32>
    %4 = vector.broadcast %3 : vector<1x128xf32> to vector<8x128xf32>
    %5 = arith.addf %2, %4 : vector<8x128xf32>
    %cst_5 = arith.constant 0.000000e+00 : f32
    %6 = vector.broadcast %cst_5 : f32 to vector<8x128xf32>
    %7 = arith.maximumf %5, %6 : vector<8x128xf32>
    %c0_6 = arith.constant 0 : index
    %c0_7 = arith.constant 0 : index
    %8 = vector.load %arg4[%c0_6, %c0_7] : memref<128x64xf32, #tpu.memory_space<vmem>>, vector<128x64xf32>
    %cst_8 = arith.constant dense<0.000000e+00> : vector<8x64xf32>
    %9 = tpu.matmul %7, %8, %cst_8 {dimension_numbers = #tpu.dot_dimension_numbers<[1], [0], [0], [1], [0, 0, 1, 1], [], []>} : vector<8x128xf32>, vector<128x64xf32>, vector<8x64xf32> -> vector<8x64xf32>
    %c0_9 = arith.constant 0 : index
    %c0_10 = arith.constant 0 : index
    %10 = vector.load %arg5[%c0_9, %c0_10] : memref<1x64xf32, #tpu.memory_space<vmem>>, vector<1x64xf32>
    %11 = vector.broadcast %10 : vector<1x64xf32> to vector<8x64xf32>
    %12 = arith.addf %9, %11 : vector<8x64xf32>
    %cst_11 = arith.constant 0.000000e+00 : f32
    %13 = vector.broadcast %cst_11 : f32 to vector<8x64xf32>
    %14 = arith.maximumf %12, %13 : vector<8x64xf32>
    %c0_12 = arith.constant 0 : index
    %c0_13 = arith.constant 0 : index
    %15 = vector.load %arg6[%c0_12, %c0_13] : memref<64x128xf32, #tpu.memory_space<vmem>>, vector<64x128xf32>
    %cst_14 = arith.constant dense<0.000000e+00> : vector<8x128xf32>
    %16 = tpu.matmul %14, %15, %cst_14 {dimension_numbers = #tpu.dot_dimension_numbers<[1], [0], [0], [1], [0, 0, 1, 1], [], []>} : vector<8x64xf32>, vector<64x128xf32>, vector<8x128xf32> -> vector<8x128xf32>
    %c0_15 = arith.constant 0 : index
    %c0_16 = arith.constant 0 : index
    %17 = vector.load %arg7[%c0_15, %c0_16] : memref<1x128xf32, #tpu.memory_space<vmem>>, vector<1x128xf32>
    %18 = vector.broadcast %17 : vector<1x128xf32> to vector<8x128xf32>
    %19 = arith.addf %16, %18 : vector<8x128xf32>
    %cst_17 = arith.constant 0.000000e+00 : f32
    %20 = vector.broadcast %cst_17 : f32 to vector<8x128xf32>
    %21 = arith.maximumf %19, %20 : vector<8x128xf32>
    %c0_18 = arith.constant 0 : index
    %c0_19 = arith.constant 0 : index
    %22 = vector.load %arg8[%c0_18, %c0_19] : memref<128x128xf32, #tpu.memory_space<vmem>>, vector<128x128xf32>
    %cst_20 = arith.constant dense<0.000000e+00> : vector<8x128xf32>
    %23 = tpu.matmul %21, %22, %cst_20 {dimension_numbers = #tpu.dot_dimension_numbers<[1], [0], [0], [1], [0, 0, 1, 1], [], []>} : vector<8x128xf32>, vector<128x128xf32>, vector<8x128xf32> -> vector<8x128xf32>
    %c0_21 = arith.constant 0 : index
    %c0_22 = arith.constant 0 : index
    %24 = vector.load %arg9[%c0_21, %c0_22] : memref<1x128xf32, #tpu.memory_space<vmem>>, vector<1x128xf32>
    %25 = vector.broadcast %24 : vector<1x128xf32> to vector<8x128xf32>
    %26 = arith.addf %23, %25 : vector<8x128xf32>
    %cst_23 = arith.constant dense<0xFF800000> : vector<8xf32>
    %27 = vector.multi_reduction <maximumf>, %26, %cst_23 [1] : vector<8x128xf32> to vector<8xf32>
    %28 = vector.shape_cast %27 : vector<8xf32> to vector<8x1xf32>
    %29 = vector.broadcast %28 : vector<8x1xf32> to vector<8x128xf32>
    %30 = arith.subf %26, %29 : vector<8x128xf32>
    %31 = math.exp %30 : vector<8x128xf32>
    %cst_24 = arith.constant dense<0.000000e+00> : vector<8xf32>
    %32 = vector.multi_reduction <add>, %31, %cst_24 [1] : vector<8x128xf32> to vector<8xf32>
    %33 = vector.shape_cast %32 : vector<8xf32> to vector<8x1xf32>
    %34 = tpu.reciprocal %33 {approx = true} : vector<8x1xf32> -> vector<8x1xf32>
    %35 = vector.broadcast %34 : vector<8x1xf32> to vector<8x128xf32>
    %36 = arith.mulf %31, %35 : vector<8x128xf32>
    %c0_25 = arith.constant 0 : index
    %c0_26 = arith.constant 0 : index
    %37 = vector.load %arg10[%c0_25, %c0_26] : memref<8x128xf32, #tpu.memory_space<vmem>>, vector<8x128xf32>
    tpu.vector_store %arg10[%c0_25, %c0_26], %36 {strides = array<i32>} : memref<8x128xf32, #tpu.memory_space<vmem>>, vector<8x128xf32>,
    %c0_27 = arith.constant 0 : index
    %c0_28 = arith.constant 0 : index
    %38 = vector.load %arg11[%c0_27, %c0_28] : memref<8x128xf32, #tpu.memory_space<vmem>>, vector<8x128xf32>
    tpu.vector_store %arg11[%c0_27, %c0_28], %21 {strides = array<i32>} : memref<8x128xf32, #tpu.memory_space<vmem>>, vector<8x128xf32>,
    return
  }
  func.func @transform_0(%arg0: i32) -> (i32, i32) {
    %c0_i32 = arith.constant 0 : i32
    %c0_i32_0 = arith.constant 0 : i32
    return %arg0, %c0_i32 : i32, i32
  }
  func.func @transform_1(%arg0: i32) -> (i32, i32) {
    %c0_i32 = arith.constant 0 : i32
    %c0_i32_0 = arith.constant 0 : i32
    %c0_i32_1 = arith.constant 0 : i32
    return %c0_i32, %c0_i32_0 : i32, i32
  }
  func.func @transform_2(%arg0: i32) -> (i32, i32) {
    %c0_i32 = arith.constant 0 : i32
    %c0_i32_0 = arith.constant 0 : i32
    %c0_i32_1 = arith.constant 0 : i32
    return %c0_i32, %c0_i32_0 : i32, i32
  }
  func.func @transform_3(%arg0: i32) -> (i32, i32) {
    %c0_i32 = arith.constant 0 : i32
    %c0_i32_0 = arith.constant 0 : i32
    %c0_i32_1 = arith.constant 0 : i32
    return %c0_i32, %c0_i32_0 : i32, i32
  }
  func.func @transform_4(%arg0: i32) -> (i32, i32) {
    %c0_i32 = arith.constant 0 : i32
    %c0_i32_0 = arith.constant 0 : i32
    %c0_i32_1 = arith.constant 0 : i32
    return %c0_i32, %c0_i32_0 : i32, i32
  }
  func.func @transform_5(%arg0: i32) -> (i32, i32) {
    %c0_i32 = arith.constant 0 : i32
    %c0_i32_0 = arith.constant 0 : i32
    %c0_i32_1 = arith.constant 0 : i32
    return %c0_i32, %c0_i32_0 : i32, i32
  }
  func.func @transform_6(%arg0: i32) -> (i32, i32) {
    %c0_i32 = arith.constant 0 : i32
    %c0_i32_0 = arith.constant 0 : i32
    %c0_i32_1 = arith.constant 0 : i32
    return %c0_i32, %c0_i32_0 : i32, i32
  }
  func.func @transform_7(%arg0: i32) -> (i32, i32) {
    %c0_i32 = arith.constant 0 : i32
    %c0_i32_0 = arith.constant 0 : i32
    %c0_i32_1 = arith.constant 0 : i32
    return %c0_i32, %c0_i32_0 : i32, i32
  }
  func.func @transform_8(%arg0: i32) -> (i32, i32) {
    %c0_i32 = arith.constant 0 : i32
    %c0_i32_0 = arith.constant 0 : i32
    %c0_i32_1 = arith.constant 0 : i32
    return %c0_i32, %c0_i32_0 : i32, i32
  }
  func.func @transform_9(%arg0: i32) -> (i32, i32) {
    %c0_i32 = arith.constant 0 : i32
    %c0_i32_0 = arith.constant 0 : i32
    return %arg0, %c0_i32 : i32, i32
  }
  func.func @transform_10(%arg0: i32) -> (i32, i32) {
    %c0_i32 = arith.constant 0 : i32
    %c0_i32_0 = arith.constant 0 : i32
    return %arg0, %c0_i32 : i32, i32
  }
}

</mosaic_0001>

<bundles_post_ra>
// kernel: forward.1
= control target key start
LH: loop header
LB: loop body
LE: loop exit
PB: predicated region body
PF: predicated region fallthrough
CT: control target
= control target key end

     0   :  { %16 = vsyncpa [#allocation3], 0  ;;  %s1150_s0 = inlined_call_operand.vmem [shape: f32[8,128], index: 0, kind: input, shape index: {}]   ;;  %s1151_s1 = inlined_call_operand.hbm [shape: f32[128,128], index: 1, kind: input, shape index: {}]   ;;  %s1152_s2 = inlined_call_operand.vmem [shape: f32[1,128], index: 2, kind: input, shape index: {}]   ;;  %s1153_s3 = inlined_call_operand.hbm [shape: f32[128,64], index: 3, kind: input, shape index: {}]   ;;  %s1154_s4 = inlined_call_operand.vmem [shape: f32[1,64], index: 4, kind: input, shape index: {}]   ;;  %s1155_s5 = inlined_call_operand.hbm [shape: f32[64,128], index: 5, kind: input, shape index: {}]   ;;  %s1156_s6 = inlined_call_operand.vmem [shape: f32[1,128], index: 6, kind: input, shape index: {}]   ;;  %s1157_s7 = inlined_call_operand.hbm [shape: f32[128,128], index: 7, kind: input, shape index: {}]   ;;  %s1158_s8 = inlined_call_operand.vmem [shape: f32[1,128], index: 8, kind: input, shape index: {}]   ;;  %s1159_s9 = inlined_call_operand.hbm [shape: f32[8,128], index: 9, kind: output, shape index: {0}]   ;;  %s1160_s10 = inlined_call_operand.hbm [shape: f32[8,128], index: 10, kind: output, shape index: {1}]  }
   0x1   :  { %17 = vsyncpa [#allocation6], 0 }
   0x2   :  { %18 = vsyncpa [#allocation9], 0 }
   0x3   :  { %19 = vsyncpa [#allocation4], 0 }
   0x4   :  { %20 = vsyncpa [#allocation12], 0  ;;  %s935_s13 = smov [#allocation5]   ;;  %s936_s15 = smov [#allocation2]  }
   0x5   :  { %s42_s14 = sshll.u32 %s935_s13, 4  ;;  %s28_s16 = sshll.u32 %s936_s15, 4  ;;  %s43_s14 = int_to_ptr.vmem [resolvable:$true] %s42_s14  ;;  %s1001_s16 = int_to_ptr.vmem [resolvable:$true] %s28_s16 }
   0x6   :  { %s793_s19 = scalar_lea.hbm %s1153_s3, 2048 }
   0x7   :  { %p794_p0 = scmp.ne.s32.totalorder %s1153_s3, %s793_s19  ;;  %p797_p1 = scmp.lt.u32.totalorder %s793_s19, %s1153_s3 }
   0x9   :  { %p799_p2 = pnand %p797_p1, %p794_p0 }
   0xb   :  { %802 = shalt.err (!%p799_p2)
}
   0xc   :  { %s803_s24 = scalar_lea.vmem %s43_s14, 2048  ;;  %p808_p4 = scmp.lt.s32.totalorder %s43_s14, %s43_s14 }
   0xd   :  { %p804_p3 = scmp.ne.s32.totalorder %s43_s14, %s803_s24  ;;  %p809_p5 = scmp.lt.s32.totalorder %s803_s24, %s803_s24 }
   0xf   :  { %p810_p6 = por %p809_p5, %p808_p4 }
  0x11   :  { %p811_p7 = pnand %p810_p6, %p804_p3 }
  0x13   :  { %814 = shalt.err (!%p811_p7)
}
  0x14   :  { %s937_s25 = smov 128   ;;  %s938_s26 = smov 8  }
  0x15   :  { %48 = dma.hbm_to_vmem [thread:$0]  %s1153_s3, 2048, %s43_s14, [#allocation6], %s937_s25, %s937_s25, %s938_s26  }
  0x16   :  { %s815_s11 = scalar_lea.hbm %s1151_s1, 2048 }
  0x17   :  { %p816_p8 = scmp.ne.s32.totalorder %s1151_s1, %s815_s11  ;;  %p819_p9 = scmp.lt.u32.totalorder %s815_s11, %s1151_s1 }
  0x19   :  { %p821_p10 = pnand %p819_p9, %p816_p8 }
  0x1b   :  { %824 = shalt.err (!%p821_p10)
}
  0x1c   :  { %s825_s18 = scalar_lea.vmem %s1001_s16, 2048  ;;  %p830_p12 = scmp.lt.s32.totalorder %s1001_s16, %s1001_s16 }
  0x1d   :  { %p826_p11 = scmp.ne.s32.totalorder %s1001_s16, %s825_s18  ;;  %p831_p13 = scmp.lt.s32.totalorder %s825_s18, %s825_s18 }
  0x1f   :  { %p832_p0 = por %p831_p13, %p830_p12 }
  0x21   :  { %p833_p1 = pnand %p832_p0, %p826_p11 }
  0x23   :  { %836 = shalt.err (!%p833_p1)
}
  0x24   :  { %34 = dma.hbm_to_vmem [thread:$0]  %s1151_s1, 2048, %s1001_s16, [#allocation3], %s937_s25, %s937_s25, %s938_s26  }
  0x25   :  { %s939_s19 = smov [#allocation7]   ;;  %s940_s21 = smov [#allocation8]  }
  0x26   :  { %s56_s20 = sshll.u32 %s939_s19, 4  ;;  %s70_s22 = sshll.u32 %s940_s21, 4  ;;  %s57_s20 = int_to_ptr.vmem [resolvable:$true] %s56_s20  ;;  %s1038_s22 = int_to_ptr.vmem [resolvable:$true] %s70_s22 }
  0x27   :  { %s837_s27 = scalar_lea.hbm %s1155_s5, 1024 }
  0x28   :  { %p838_p2 = scmp.ne.s32.totalorder %s1155_s5, %s837_s27  ;;  %p841_p3 = scmp.lt.u32.totalorder %s837_s27, %s1155_s5 }
  0x2a   :  { %p843_p4 = pnand %p841_p3, %p838_p2 }
  0x2c   :  { %846 = shalt.err (!%p843_p4)
}
  0x2d   :  { %s847_s1 = scalar_lea.vmem %s57_s20, 1024  ;;  %p852_p6 = scmp.lt.s32.totalorder %s57_s20, %s57_s20 }
  0x2e   :  { %p848_p5 = scmp.ne.s32.totalorder %s57_s20, %s847_s1  ;;  %p853_p7 = scmp.lt.s32.totalorder %s847_s1, %s847_s1 }
  0x30   :  { %p854_p8 = por %p853_p7, %p852_p6 }
  0x32   :  { %p855_p9 = pnand %p854_p8, %p848_p5 }
  0x34   :  { %858 = shalt.err (!%p855_p9)
}
  0x35   :  { %62 = dma.hbm_to_vmem [thread:$0]  %s1155_s5, 1024, %s57_s20, [#allocation6], %s937_s25, %s937_s25, %s938_s26  }
  0x36   :  { %s859_s17 = scalar_lea.hbm %s1157_s7, 2048 }
  0x37   :  { %p860_p10 = scmp.ne.s32.totalorder %s1157_s7, %s859_s17  ;;  %p863_p11 = scmp.lt.u32.totalorder %s859_s17, %s1157_s7 }
  0x39   :  { %p865_p12 = pnand %p863_p11, %p860_p10 }
  0x3b   :  { %868 = shalt.err (!%p865_p12)
}
  0x3c   :  { %s869_s21 = scalar_lea.vmem %s1038_s22, 2048  ;;  %p874_p0 = scmp.lt.s32.totalorder %s1038_s22, %s1038_s22 }
  0x3d   :  { %p870_p13 = scmp.ne.s32.totalorder %s1038_s22, %s869_s21  ;;  %p875_p1 = scmp.lt.s32.totalorder %s869_s21, %s869_s21 }
  0x3f   :  { %p876_p2 = por %p875_p1, %p874_p0 }
  0x41   :  { %p877_p3 = pnand %p876_p2, %p870_p13 }
  0x43   :  { %880 = shalt.err (!%p877_p3)
}
  0x44   :  { %76 = dma.hbm_to_vmem [thread:$0]  %s1157_s7, 2048, %s1038_s22, [#allocation9], %s937_s25, %s937_s25, %s938_s26  }
  0x45   :  { %925 = dma.done.wait [#allocation3], 2048  }
  0x46   :  { %926 = vsyncadd [#allocation3], 4294965248 }
  0x47   :  { %927 = dma.done.wait [#allocation6], 3072  }
  0x48   :  { %928 = vsyncadd [#allocation6], 4294964224 }
  0x49   :  { %929 = dma.done.wait [#allocation9], 2048  }
  0x4a   :  { %930 = vsyncadd [#allocation9], 4294965248  ;;  %v941_v0 = vmov 0.0|0.0   ;;  %vm942_vm0 = vmmov 0   ;;  %v943_v1 = vmov 0.0   ;;  %v92_v2 = vld [vmem:[#allocation2] sm:$0xff] }
  0x4b   :  { %694 = vmatprep.subr.bf16.mxu0 %v941_v0  ;;  %602 = vmatprep.mubr.msk.f32.mxu0 %vm942_vm0, %v943_v1  ;;  %v93_v3 = vld [vmem:[#allocation2 + $0x8] sm:$0xff]  ;;  %v94_v4 = vld [vmem:[#allocation2 + $0x10] sm:$0xff]  ;;  %v95_v6 = vld [vmem:[#allocation2 + $0x18] sm:$0xff]  ;;  %vm295_vm1 = vcmask 523264  }
  0x4c   :  { %718 = vmatprep.subr.bf16.mxu1 %v941_v0  ;;  %637 = vmatprep.mubr.msk.f32.mxu1 %vm942_vm0, %v943_v1  ;;  %v695_v5 = vpack.c.bf16 %v93_v3, %v92_v2  ;;  %v698_v7 = vpack.c.bf16 %v95_v6, %v94_v4  ;;  %v96_v8 = vld [vmem:[#allocation2 + $0x20] sm:$0xff]  ;;  %v97_v9 = vld [vmem:[#allocation2 + $0x28] sm:$0xff]  ;;  %v188_v12 = vld [vmem:[#allocation5 + $0x10] sm:$0xff] }
  0x4d   :  { %v186_v10 = vld [vmem:[#allocation5] sm:$0xff]  ;;  %v187_v11 = vld [vmem:[#allocation5 + $0x8] sm:$0xff]  ;;  %v189_v13 = vld [vmem:[#allocation5 + $0x18] sm:$0xff]  ;;  %v701_v14 = vpack.c.bf16 %v97_v9, %v96_v8 }
  0x4e   :  { %696 = vmatpush3.bf16.msra.mxu0 %v695_v5  ;;  %v719_v15 = vpack.c.bf16 %v187_v11, %v186_v10  ;;  %v98_v16 = vld [vmem:[#allocation2 + $0x30] sm:$0xff]  ;;  %v99_v17 = vld [vmem:[#allocation2 + $0x38] sm:$0xff]  ;;  %v722_v18 = vpack.c.bf16 %v189_v13, %v188_v12  ;;  %v190_v19 = vld [vmem:[#allocation5 + $0x20] sm:$0xff] }
  0x4f   :  { %697 = vmatprep.subr.bf16.mxu0 %v941_v0  ;;  %v191_v20 = vld [vmem:[#allocation5 + $0x28] sm:$0xff]  ;;  %v704_v21 = vpack.c.bf16 %v99_v17, %v98_v16  ;;  %v100_v22 = vld [vmem:[#allocation2 + $0x40] sm:$0xff]  ;;  %v192_v25 = vld [vmem:[#allocation5 + $0x30] sm:$0xff] }
  0x50   :  { %720 = vmatpush3.bf16.msra.mxu1 %v719_v15  ;;  %v101_v23 = vld [vmem:[#allocation2 + $0x48] sm:$0xff]  ;;  %v725_v24 = vpack.c.bf16 %v191_v20, %v190_v19  ;;  %v193_v26 = vld [vmem:[#allocation5 + $0x38] sm:$0xff]  ;;  %v102_v28 = vld [vmem:[#allocation2 + $0x50] sm:$0xff] }
  0x51   :  { %721 = vmatprep.subr.bf16.mxu1 %v941_v0  ;;  %v707_v27 = vpack.c.bf16 %v101_v23, %v100_v22  ;;  %v103_v29 = vld [vmem:[#allocation2 + $0x58] sm:$0xff]  ;;  %v728_v30 = vpack.c.bf16 %v193_v26, %v192_v25  ;;  %v194_v31 = vld [vmem:[#allocation5 + $0x40] sm:$0xff]  ;;  %v195_v32 = vld [vmem:[#allocation5 + $0x48] sm:$0xff] }
  0x52   :  { %699 = vmatpush3.bf16.msra.mxu0 %v698_v7  ;;  %v710_v33 = vpack.c.bf16 %v103_v29, %v102_v28  ;;  %v104_v34 = vld [vmem:[#allocation2 + $0x60] sm:$0xff]  ;;  %v105_v35 = vld [vmem:[#allocation2 + $0x68] sm:$0xff]  ;;  %v731_v36 = vpack.c.bf16 %v195_v32, %v194_v31  ;;  %v196_v37 = vld [vmem:[#allocation5 + $0x50] sm:$0xff] }
  0x53   :  { %700 = vmatprep.subr.bf16.mxu0 %v941_v0  ;;  %v197_v38 = vld [vmem:[#allocation5 + $0x58] sm:$0xff]  ;;  %v713_v39 = vpack.c.bf16 %v105_v35, %v104_v34  ;;  %v106_v40 = vld [vmem:[#allocation2 + $0x70] sm:$0xff]  ;;  %v198_v43 = vld [vmem:[#allocation5 + $0x60] sm:$0xff] }
  0x54   :  { %723 = vmatpush3.bf16.msra.mxu1 %v722_v18  ;;  %v107_v41 = vld [vmem:[#allocation2 + $0x78] sm:$0xff]  ;;  %v734_v42 = vpack.c.bf16 %v197_v38, %v196_v37  ;;  %v199_v44 = vld [vmem:[#allocation5 + $0x68] sm:$0xff]  ;;  %v91_v47 = vld [vmem:[%s1150_s0] sm:$0xff] }
  0x55   :  { %724 = vmatprep.subr.bf16.mxu1 %v941_v0  ;;  %v716_v45 = vpack.c.bf16 %v107_v41, %v106_v40  ;;  %v737_v46 = vpack.c.bf16 %v199_v44, %v198_v43  ;;  %v200_v48 = vld [vmem:[#allocation5 + $0x70] sm:$0xff]  ;;  %v201_v49 = vld [vmem:[#allocation5 + $0x78] sm:$0xff]  ;;  %v280_v51 = vld [vmem:[#allocation7] sm:$0xff] }
  0x56   :  { %702 = vmatpush3.bf16.msra.mxu0 %v701_v14  ;;  %v740_v50 = vpack.c.bf16 %v201_v49, %v200_v48  ;;  %v281_v52 = vld [vmem:[#allocation7 + $0x8] sm:$0xff]  ;;  %v282_v53 = vld [vmem:[#allocation7 + $0x10] sm:$0xff]  ;;  %v283_v55 = vld [vmem:[#allocation7 + $0x18] sm:$0xff] }
  0x57   :  { %703 = vmatprep.subr.bf16.mxu0 %v941_v0  ;;  %v743_v54 = vpack.c.bf16 %v281_v52, %v280_v51  ;;  %v746_v56 = vpack.c.bf16 %v283_v55, %v282_v53  ;;  %v284_v57 = vld [vmem:[#allocation7 + $0x20] sm:$0xff]  ;;  %v285_v58 = vld [vmem:[#allocation7 + $0x28] sm:$0xff]  ;;  %v286_v3 = vld [vmem:[#allocation7 + $0x30] sm:$0xff] }
  0x58   :  { %726 = vmatpush3.bf16.msra.mxu1 %v725_v24  ;;  %v749_v59 = vpack.c.bf16 %v285_v58, %v284_v57  ;;  %v505_v60 = vld [vmem:[%s1152_s2] ss:$0 sm:$0xff]  ;;  %v287_v4 = vld [vmem:[#allocation7 + $0x38] sm:$0xff]  ;;  %v371_v7 = vld [vmem:[#allocation8 + $0x8] sm:$0xff] }
  0x59   :  { %727 = vmatprep.subr.bf16.mxu1 %v941_v0  ;;  %v752_v5 = vpack.c.bf16 %v287_v4, %v286_v3  ;;  %v370_v6 = vld [vmem:[#allocation8] sm:$0xff]  ;;  %v372_v8 = vld [vmem:[#allocation8 + $0x10] sm:$0xff]  ;;  %v373_v10 = vld [vmem:[#allocation8 + $0x18] sm:$0xff] }
  0x5a   :  { %705 = vmatpush3.bf16.msra.mxu0 %v704_v21  ;;  %v755_v9 = vpack.c.bf16 %v371_v7, %v370_v6  ;;  %v758_v11 = vpack.c.bf16 %v373_v10, %v372_v8  ;;  %v374_v12 = vld [vmem:[#allocation8 + $0x20] sm:$0xff]  ;;  %v375_v13 = vld [vmem:[#allocation8 + $0x28] sm:$0xff]  ;;  %v377_v15 = vld [vmem:[#allocation8 + $0x38] sm:$0xff] }
  0x5b   :  { %706 = vmatprep.subr.bf16.mxu0 %v941_v0  ;;  %v761_v14 = vpack.c.bf16 %v375_v13, %v374_v12  ;;  %v378_v17 = vld [vmem:[#allocation8 + $0x40] sm:$0xff]  ;;  %v379_v18 = vld [vmem:[#allocation8 + $0x48] sm:$0xff]  ;;  %v380_v20 = vld [vmem:[#allocation8 + $0x50] sm:$0xff] }
  0x5c   :  { %729 = vmatpush3.bf16.msra.mxu1 %v728_v30  ;;  %v767_v19 = vpack.c.bf16 %v379_v18, %v378_v17  ;;  %v381_v21 = vld [vmem:[#allocation8 + $0x58] sm:$0xff]  ;;  %v382_v23 = vld [vmem:[#allocation8 + $0x60] sm:$0xff]  ;;  %v383_v24 = vld [vmem:[#allocation8 + $0x68] sm:$0xff] }
  0x5d   :  { %730 = vmatprep.subr.bf16.mxu1 %v941_v0  ;;  %v770_v22 = vpack.c.bf16 %v381_v21, %v380_v20  ;;  %v773_v25 = vpack.c.bf16 %v383_v24, %v382_v23  ;;  %v506_v26 = vld [vmem:[%s1154_s4] ss:$0 sm:$0xff]  ;;  %v384_v31 = vld [vmem:[#allocation8 + $0x70] sm:$0xff]  ;;  %v385_v32 = vld [vmem:[#allocation8 + $0x78] sm:$0xff] }
  0x5e   :  { %708 = vmatpush3.bf16.msra.mxu0 %v707_v27  ;;  %v507_v34 = vld [vmem:[%s1156_s6] ss:$0 sm:$0xff]  ;;  %s944_s6 = smov [#allocation11]  }
  0x5f   :  { %709 = vmatprep.subr.bf16.mxu0 %v941_v0  ;;  %v509_v38 = vld [vmem:[%s1158_s8] ss:$0 sm:$0xff]  ;;  %s490_s28 = sshll.u32 %s944_s6, 4  ;;  %s491_s28 = int_to_ptr.vmem [resolvable:$true] %s490_s28 }
  0x60   :  { %732 = vmatpush3.bf16.msra.mxu1 %v731_v36  ;;  %s881_s29 = scalar_lea.vmem %s491_s28, 128  ;;  %p886_p5 = scmp.lt.s32.totalorder %s491_s28, %s491_s28 }
  0x61   :  { %733 = vmatprep.subr.bf16.mxu1 %v941_v0  ;;  %p882_p4 = scmp.ne.s32.totalorder %s491_s28, %s881_s29  ;;  %p887_p6 = scmp.lt.s32.totalorder %s881_s29, %s881_s29 }
  0x62   :  { %711 = vmatpush3.bf16.msra.mxu0 %v710_v33  ;;  %v776_v33 = vpack.c.bf16 %v385_v32, %v384_v31 }
  0x63   :  { %712 = vmatprep.subr.bf16.mxu0 %v941_v0  ;;  %p888_p7 = por %p887_p6, %p886_p5 }
  0x64   :  { %735 = vmatpush3.bf16.msra.mxu1 %v734_v42 }
  0x65   :  { %736 = vmatprep.subr.bf16.mxu1 %v941_v0  ;;  %p889_p8 = pnand %p888_p7, %p882_p4 }
  0x66   :  { %714 = vmatpush3.bf16.msra.mxu0 %v713_v39 }
  0x67   :  { %715 = vmatprep.subr.bf16.mxu0 %v941_v0 }
  0x68   :  { %738 = vmatpush3.bf16.msra.mxu1 %v737_v46 }
  0x69   :  { %739 = vmatprep.subr.bf16.mxu1 %v941_v0 }
  0x6a   :  { %717 = vmatpush3.bf16.msra.mxu0 %v716_v45 }
  0x6b   :  { %742 = vmatprep.subr.bf16.mxu0 %v941_v0 }
  0x6c   :  { %741 = vmatpush3.bf16.msra.mxu1 %v740_v50 }
  0x6d   :  { %603 = vmatmul.mubr.f32.vlgmr.msra.gmra.mrb[0].mxu0 %v91_v47  ;;  %754 = vmatprep.subr.bf16.mxu1 %v941_v0 }
  0x6e   :  { %656 = vmatprep.mubr.msk.f32.mxu0 %vm942_vm0, %v943_v1  ;;  %744 = vmatpush3.bf16.msra.mxu0 %v743_v54 }
  0x6f   :  { %745 = vmatprep.subr.bf16.mxu0 %v941_v0 }
  0x72   :  { %747 = vmatpush3.bf16.msra.mxu0 %v746_v56 }
  0x73   :  { %748 = vmatprep.subr.bf16.mxu0 %v941_v0 }
  0x76   :  { %750 = vmatpush3.bf16.msra.mxu0 %v749_v59 }
  0x77   :  { %751 = vmatprep.subr.bf16.mxu0 %v941_v0 }
  0x7a   :  { %753 = vmatpush3.bf16.msra.mxu0 %v752_v5 }
 0x140   :  { %v181_v61 = vpop.f32.mrb[0].mxu0 }
 0x141   :  { %v182_v62 = vadd.f32 %v505_v60, %v181_v61  ;;  %v604_v63 = vpop.f32.mrb[1].mxu0 }
 0x143   :  { %v185_v2 = vmax.f32 %v182_v62, 0.0 }
 0x145   :  { %638 = vmatmul.mubr.f32.vlgmr.msra.gmra.mrb[0].mxu1 %v185_v2 }
 0x146   :  { %691 = vmatprep.mubr.msk.f32.mxu1 %vm942_vm0, %v943_v1  ;;  %756 = vmatpush3.bf16.msra.mxu1 %v755_v9  ;;  %v376_v1 = vld [vmem:[#allocation8 + $0x30] sm:$0xff] }
 0x147   :  { %757 = vmatprep.subr.bf16.mxu1 %v941_v0  ;;  %v764_v16 = vpack.c.bf16 %v377_v15, %v376_v1 }
 0x14a   :  { %759 = vmatpush3.bf16.msra.mxu1 %v758_v11 }
 0x14b   :  { %760 = vmatprep.subr.bf16.mxu1 %v941_v0 }
 0x14e   :  { %762 = vmatpush3.bf16.msra.mxu1 %v761_v14 }
 0x14f   :  { %763 = vmatprep.subr.bf16.mxu1 %v941_v0 }
 0x152   :  { %765 = vmatpush3.bf16.msra.mxu1 %v764_v16 }
 0x153   :  { %766 = vmatprep.subr.bf16.mxu1 %v941_v0 }
 0x156   :  { %768 = vmatpush3.bf16.msra.mxu1 %v767_v19 }
 0x157   :  { %769 = vmatprep.subr.bf16.mxu1 %v941_v0 }
 0x15a   :  { %771 = vmatpush3.bf16.msra.mxu1 %v770_v22 }
 0x15b   :  { %772 = vmatprep.subr.bf16.mxu1 %v941_v0 }
 0x15e   :  { %774 = vmatpush3.bf16.msra.mxu1 %v773_v25 }
 0x15f   :  { %775 = vmatprep.subr.bf16.mxu1 %v941_v0 }
 0x162   :  { %777 = vmatpush3.bf16.msra.mxu1 %v776_v33 }
 0x218   :  { %v275_v27 = vpop.f32.mrb[0].mxu1 }
 0x219   :  { %v276_v28 = vadd.f32 %v506_v26, %v275_v27  ;;  %v639_v29 = vpop.f32.mrb[1].mxu1 }
 0x21b   :  { %v279_v30 = vmax.f32 %v276_v28, 0.0 }
 0x21d   :  { %657 = vmatmul.mubr.msk.f32.vlgmr.msra.gmra.mrb[2].mxu0 %vm295_vm1, %v279_v30 }
 0x2f0   :  { %v365_v35 = vpop.f32.mrb[2].mxu0 }
 0x2f1   :  { %v366_v0 = vadd.f32 %v507_v34, %v365_v35  ;;  %v658_v36 = vpop.f32.mrb[3].mxu0 }
 0x2f3   :  { %v369_v37 = vmax.f32 %v366_v0, 0.0 }
 0x2f5   :  { %473 = vst [vmem:[#allocation11] sm:$0xff] %v369_v37  ;;  %692 = vmatmul.mubr.f32.vlgmr.msra.gmra.mrb[2].mxu1 %v369_v37 }
 0x3c8   :  { %v459_v39 = vpop.f32.mrb[2].mxu1 }
 0x3c9   :  { %v460_v40 = vadd.f32 %v509_v38, %v459_v39  ;;  %v693_v41 = vpop.f32.mrb[3].mxu1 }
 0x3cb   :  { %463 = vmax.xlane.f32.xlu0 %v460_v40 }
 0x458   :  { %v464_v42 = vpop.xlane.xlu0 %463 }
 0x459   :  { %v465_v43 = vsub.f32 %v460_v40, %v464_v42 }
 0x45b   :  { %v466_v44 = vmul.f32 1.442695, %v465_v43 }
 0x45d   :  { %789 = vpow2.f32 %v466_v44 }
 0x467   :  { %v790_v45 = vpop.eup %789 }
 0x468   :  { %468 = vadd.xlane.f32.xlu0 %v790_v45 }
 0x469   :  { %892 = shalt.err (!%p889_p8)
}
 0x46a   :  { %s893_s11 = scalar_lea.hbm %s1160_s10, 128 }
 0x46b   :  { %p894_p9 = scmp.ne.s32.totalorder %s1160_s10, %s893_s11  ;;  %p897_p10 = scmp.lt.u32.totalorder %s893_s11, %s1160_s10 }
 0x46d   :  { %p899_p11 = pnand %p897_p10, %p894_p9 }
 0x46f   :  { %902 = shalt.err (!%p899_p11)
}
 0x470   :  { %493 = dma.vmem_to_hbm [thread:$0]  %s491_s28, 128, %s1160_s10, [#allocation12]  }
 0x471   :  { %s945_s18 = smov [#allocation10]  }
 0x472   :  { %s480_s3 = sshll.u32 %s945_s18, 4  ;;  %s481_s3 = int_to_ptr.vmem [resolvable:$true] %s480_s3 }
 0x473   :  { %s903_s14 = scalar_lea.vmem %s481_s3, 128  ;;  %p908_p13 = scmp.lt.s32.totalorder %s481_s3, %s481_s3 }
 0x474   :  { %p904_p12 = scmp.ne.s32.totalorder %s481_s3, %s903_s14  ;;  %p909_p0 = scmp.lt.s32.totalorder %s903_s14, %s903_s14 }
 0x476   :  { %p910_p1 = por %p909_p0, %p908_p13 }
 0x478   :  { %p911_p2 = pnand %p910_p1, %p904_p12 }
 0x4f5   :  { %v469_v46 = vpop.xlane.xlu0 %468 }
 0x4f6   :  { %791 = vrcp.f32 %v469_v46 }
 0x500   :  { %v792_v47 = vpop.eup %791 }
 0x501   :  { %v471_v48 = vmul.f32 %v792_v47, %v790_v45 }
 0x503   :  { %472 = vst [vmem:[#allocation10] sm:$0xff] %v471_v48 }
 0x504   :  { %914 = shalt.err (!%p911_p2)
}
 0x505   :  { %s915_s5 = scalar_lea.hbm %s1159_s9, 128 }
 0x506   :  { %p916_p3 = scmp.ne.s32.totalorder %s1159_s9, %s915_s5  ;;  %p919_p4 = scmp.lt.u32.totalorder %s915_s5, %s1159_s9 }
 0x508   :  { %p921_p5 = pnand %p919_p4, %p916_p3 }
 0x50a   :  { %924 = shalt.err (!%p921_p5)
}
 0x50b   :  { %483 = dma.vmem_to_hbm [thread:$0]  %s481_s3, 128, %s1159_s9, [#allocation4]  }
 0x50c   :  { %931 = dma.done.wait [#allocation4], 128  }
 0x50d   :  { %932 = vsyncadd [#allocation4], 4294967168 }
 0x50e   :  { %933 = dma.done.wait [#allocation12], 128  }
 0x50f   :  { %934 = vsyncadd [#allocation12], 4294967168 }
 0x510   :  { %500 = vsyncpa [#allocation3], 1 }
 0x511   :  { %501 = vsyncpa [#allocation6], 1 }
 0x512   :  { %502 = vsyncpa [#allocation9], 1 }
 0x513   :  { %503 = vsyncpa [#allocation4], 1 }
 0x514   :  { %504 = vsyncpa [#allocation12], 1 }

</bundles_post_ra>
